<compile_context>
chip_gen: v6e
topology: v6e:2x2x1
jax: 0.10.0
libtpu: 0.0.40
codegen_flags: <defaults>
</compile_context>

<pallas_src>
import functools

import jax
import jax.numpy as jnp
from jax import lax
from jax.experimental import pallas as pl
from jax.experimental.pallas import tpu as pltpu

LANES = 128
SUBLANES = 8


def _sq_diff_partial_kernel(yhat_ref, y_ref, o_ref, *, tile_rows,
                            steps_per_part, m_rows, needs_mask):
    """Accumulate per-part sum of squared differences into a (1, 8, 128) block."""
    p = pl.program_id(0)   # partition (parallel axis, one per TensorCore on v7x)
    s = pl.program_id(1)   # reduction step (arbitrary axis)

    @pl.when(s == 0)
    def _():
        o_ref[...] = jnp.zeros_like(o_ref)

    d = yhat_ref[...].astype(jnp.float32) - y_ref[...].astype(jnp.float32)
    dd = d * d

    if needs_mask:
        # Static flag: only emitted when the grid does not divide the row count.
        # Zero out garbage rows of a ragged/clamped block via the global row id.
        blk = p * steps_per_part + s
        row0 = blk * tile_rows
        rows = row0 + lax.broadcasted_iota(jnp.int32, (tile_rows, LANES), 0)
        dd = jnp.where(rows < m_rows, dd, 0.0)

    # Sublane-aligned VPU accumulation into a vreg-shaped accumulator; the
    # single cross-lane/cross-sublane reduce is deferred to the wrapper.
    o_ref[...] += jnp.sum(
        dd.reshape(tile_rows // SUBLANES, SUBLANES, LANES), axis=0
    )[None]


def rmse_loss(yhat, y, *, tile_rows=2048, num_parts=2):
    assert yhat.shape == y.shape, "yhat and y must have the same shape"
    assert tile_rows % SUBLANES == 0
    n_elems = int(yhat.size)
    assert n_elems > 0

    yhat_f = jnp.ravel(yhat)
    y_f = jnp.ravel(y)

    # Minimal padding: only pad up to a multiple of 8*128 so the flat array
    # reshapes to a lane-dense (M, 128) slab with M % 8 == 0.  Pads are zero in
    # both inputs -> contribute 0 to the sum.  Typical sizes need no pad/copy.
    align = SUBLANES * LANES
    padded = pl.cdiv(n_elems, align) * align
    pad = padded - n_elems
    if pad:
        # TODO(synk): for huge, non-128-aligned inputs this pad is one extra
        # HBM pass; could be avoided by processing the <1024-elem tail in JAX.
        yhat_f = jnp.pad(yhat_f, (0, pad))
        y_f = jnp.pad(y_f, (0, pad))

    m_rows = padded // LANES
    yhat2d = yhat_f.reshape(m_rows, LANES)
    y2d = y_f.reshape(m_rows, LANES)

    tile = min(tile_rows, m_rows)            # multiple of 8 either way
    steps_total = pl.cdiv(m_rows, tile)
    parts = num_parts if steps_total >= num_parts else 1
    spp = pl.cdiv(steps_total, parts)        # reduction steps per partition
    needs_mask = (m_rows % tile != 0) or (steps_total % parts != 0)

    def in_index(p, s):
        # Clamp so duplicated trailing blocks stay in-bounds; their contribution
        # is zeroed by the in-kernel row mask.
        return (jnp.minimum(p * spp + s, steps_total - 1), 0)

    kernel = functools.partial(
        _sq_diff_partial_kernel,
        tile_rows=tile, steps_per_part=spp, m_rows=m_rows, needs_mask=needs_mask)

    cost = pl.CostEstimate(
        flops=3 * n_elems,
        transcendentals=0,
        bytes_accessed=(yhat2d.size * yhat2d.dtype.itemsize
                        + y2d.size * y2d.dtype.itemsize
                        + parts * SUBLANES * LANES * 4),
    )

    partials = pl.pallas_call(
        kernel,
        out_shape=jax.ShapeDtypeStruct((parts, SUBLANES, LANES), jnp.float32),
        grid_spec=pltpu.PrefetchScalarGridSpec(
            num_scalar_prefetch=0,
            grid=(parts, spp),
            in_specs=[
                pl.BlockSpec((tile, LANES), in_index),
                pl.BlockSpec((tile, LANES), in_index),
            ],
            out_specs=pl.BlockSpec((1, SUBLANES, LANES), lambda p, s: (p, 0, 0)),
        ),
        compiler_params=pltpu.CompilerParams(
            dimension_semantics=("parallel", "arbitrary"),
        ),
        cost_estimate=cost,
    )(yhat2d, y2d)

    # Tiny epilogue in plain JAX: one cross-lane reduce over (parts, 8, 128),
    # then mean and sqrt (keeps the kernel output lane-dense / unmasked).
    mse = jnp.sum(partials) / jnp.float32(n_elems)
    return jnp.sqrt(mse)


if __name__ == "__main__":
    key = jax.random.PRNGKey(0)
    k1, k2, k3, k4 = jax.random.split(key, 4)

    # Small shapes consistent with a typical regression output (NCHW-like).
    yhat = jax.random.normal(k1, (2, 4, 16, 16), dtype=jnp.float32)
    y = jax.random.normal(k2, (2, 4, 16, 16), dtype=jnp.float32)

    loss = rmse_loss(yhat, y)
    jax.block_until_ready(loss)
    ref = jnp.sqrt(jnp.mean((yhat - y) ** 2))
    assert jnp.allclose(loss, ref, rtol=1e-5, atol=1e-6), (loss, ref)

    # Exercise the ragged-grid / two-partition masked path with a tiny tile.
    yhat2 = jax.random.normal(k3, (40, 128), dtype=jnp.float32)
    y2 = jax.random.normal(k4, (40, 128), dtype=jnp.float32)
    loss2 = rmse_loss(yhat2, y2, tile_rows=16)
    jax.block_until_ready(loss2)
    ref2 = jnp.sqrt(jnp.mean((yhat2 - y2) ** 2))
    assert jnp.allclose(loss2, ref2, rtol=1e-5, atol=1e-6), (loss2, ref2)

    print("KERNEL_OK")
</pallas_src>

<mosaic_0001>
module attributes {stable_mosaic.version = 11 : i64} {
  func.func @_sq_diff_partial_kernel(%arg0: i32, %arg1: i32, %arg2: memref<16x128xf32, #tpu.memory_space<vmem>>, %arg3: memref<16x128xf32, #tpu.memory_space<vmem>>, %arg4: memref<1x8x128xf32, #tpu.memory_space<vmem>>) attributes {dimension_semantics = [#tpu.dimension_semantics<parallel>, #tpu.dimension_semantics<arbitrary>], iteration_bounds = array<i64: 1, 1>, scalar_prefetch = 0 : i64, scratch_operands = 0 : i64, tpu.core_type = #tpu.core_type<tc>, window_params = [{transform_indices = @transform_0, window_bounds = array<i64: 16, 128>}, {transform_indices = @transform_1, window_bounds = array<i64: 16, 128>}, {transform_indices = @transform_2, window_bounds = array<i64: 1, 8, 128>}]} {
    %c0_i32 = arith.constant 0 : i32
    %0 = arith.cmpi eq, %arg1, %c0_i32 : i32
    %1 = arith.extui %0 : i1 to i32
    %c0_i32_0 = arith.constant 0 : i32
    %2 = arith.cmpi ne, %1, %c0_i32_0 : i32
    scf.if %2 {
      %cst_10 = arith.constant 0.000000e+00 : f32
      %13 = vector.broadcast %cst_10 : f32 to vector<1x8x128xf32>
      %c0_11 = arith.constant 0 : index
      %c0_12 = arith.constant 0 : index
      %c0_13 = arith.constant 0 : index
      %14 = vector.load %arg4[%c0_11, %c0_12, %c0_13] : memref<1x8x128xf32, #tpu.memory_space<vmem>>, vector<1x8x128xf32>
      tpu.vector_store %arg4[%c0_11, %c0_12, %c0_13], %13 {strides = array<i32>} : memref<1x8x128xf32, #tpu.memory_space<vmem>>, vector<1x8x128xf32>,
    } else {
    }
    %c0 = arith.constant 0 : index
    %c0_1 = arith.constant 0 : index
    %3 = vector.load %arg2[%c0, %c0_1] : memref<16x128xf32, #tpu.memory_space<vmem>>, vector<16x128xf32>
    %c0_2 = arith.constant 0 : index
    %c0_3 = arith.constant 0 : index
    %4 = vector.load %arg3[%c0_2, %c0_3] : memref<16x128xf32, #tpu.memory_space<vmem>>, vector<16x128xf32>
    %5 = arith.subf %3, %4 : vector<16x128xf32>
    %6 = arith.mulf %5, %5 : vector<16x128xf32>
    %c0_4 = arith.constant 0 : index
    %c0_5 = arith.constant 0 : index
    %c0_6 = arith.constant 0 : index
    %7 = vector.load %arg4[%c0_4, %c0_5, %c0_6] : memref<1x8x128xf32, #tpu.memory_space<vmem>>, vector<1x8x128xf32>
    %8 = vector.shape_cast %6 : vector<16x128xf32> to vector<2x8x128xf32>
    %cst = arith.constant dense<0.000000e+00> : vector<8x128xf32>
    %9 = vector.multi_reduction <add>, %8, %cst [0] : vector<2x8x128xf32> to vector<8x128xf32>
    %10 = vector.shape_cast %9 : vector<8x128xf32> to vector<1x8x128xf32>
    %11 = arith.addf %7, %10 : vector<1x8x128xf32>
    %c0_7 = arith.constant 0 : index
    %c0_8 = arith.constant 0 : index
    %c0_9 = arith.constant 0 : index
    %12 = vector.load %arg4[%c0_7, %c0_8, %c0_9] : memref<1x8x128xf32, #tpu.memory_space<vmem>>, vector<1x8x128xf32>
    tpu.vector_store %arg4[%c0_7, %c0_8, %c0_9], %11 {strides = array<i32>} : memref<1x8x128xf32, #tpu.memory_space<vmem>>, vector<1x8x128xf32>,
    return
  }
  func.func @transform_0(%arg0: i32, %arg1: i32) -> (i32, i32) {
    %c1_i32 = arith.constant 1 : i32
    %0 = arith.muli %arg0, %c1_i32 : i32
    %1 = arith.addi %0, %arg1 : i32
    %c0_i32 = arith.constant 0 : i32
    %2 = arith.minsi %1, %c0_i32 : i32
    %c0_i32_0 = arith.constant 0 : i32
    %c0_i32_1 = arith.constant 0 : i32
    return %2, %c0_i32_0 : i32, i32
  }
  func.func @transform_1(%arg0: i32, %arg1: i32) -> (i32, i32) {
    %c1_i32 = arith.constant 1 : i32
    %0 = arith.muli %arg0, %c1_i32 : i32
    %1 = arith.addi %0, %arg1 : i32
    %c0_i32 = arith.constant 0 : i32
    %2 = arith.minsi %1, %c0_i32 : i32
    %c0_i32_0 = arith.constant 0 : i32
    %c0_i32_1 = arith.constant 0 : i32
    return %2, %c0_i32_0 : i32, i32
  }
  func.func @transform_2(%arg0: i32, %arg1: i32) -> (i32, i32, i32) {
    %c0_i32 = arith.constant 0 : i32
    %c0_i32_0 = arith.constant 0 : i32
    %c0_i32_1 = arith.constant 0 : i32
    return %arg0, %c0_i32, %c0_i32_0 : i32, i32, i32
  }
}

</mosaic_0001>

<bundles_post_ra>
// kernel: tpu_custom_call.1
= control target key start
LH: loop header
LB: loop body
LE: loop exit
PB: predicated region body
PF: predicated region fallthrough
CT: control target
= control target key end

     0   :  { %7 = vsyncpa [#allocation3], 0  ;;  %s198_s0 = inlined_call_operand.hbm [shape: f32[16,128], index: 0, kind: input, shape index: {}]   ;;  %s199_s1 = inlined_call_operand.hbm [shape: f32[16,128], index: 1, kind: input, shape index: {}]   ;;  %s200_s2 = inlined_call_operand.hbm [shape: f32[1,8,128], index: 2, kind: output, shape index: {}]  }
   0x1   :  { %8 = vsyncpa [#allocation6], 0 }
   0x2   :  { %9 = vsyncpa [#allocation4], 0  ;;  %s169_s9 = smov [#allocation2]  }
   0x3   :  { %s21_s10 = sshll.u32 %s169_s9, 4  ;;  %s22_s10 = int_to_ptr.vmem [resolvable:$true] %s21_s10 }
   0x4   :  { %s111_s11 = scalar_lea.vmem %s22_s10, 256  ;;  %p116_p1 = scmp.lt.s32.totalorder %s22_s10, %s22_s10 }
   0x5   :  { %p112_p0 = scmp.ne.s32.totalorder %s22_s10, %s111_s11  ;;  %p117_p2 = scmp.lt.s32.totalorder %s111_s11, %s111_s11 }
   0x7   :  { %p118_p3 = por %p117_p2, %p116_p1 }
   0x9   :  { %p119_p4 = pnand %p118_p3, %p112_p0 }
   0xb   :  { %122 = shalt.err (!%p119_p4)
}
   0xc   :  { %s170_s12 = smov 128   ;;  %s171_s13 = smov 8  }
   0xd   :  { %27 = dma.hbm_to_vmem [thread:$0]  %s198_s0, 256, %s22_s10, [#allocation3], %s170_s12, %s170_s12, %s171_s13  }
   0xe   :  { %s172_s16 = smov [#allocation5]  }
   0xf   :  { %s39_s17 = sshll.u32 %s172_s16, 4  ;;  %s40_s17 = int_to_ptr.vmem [resolvable:$true] %s39_s17 }
  0x10   :  { %s131_s18 = scalar_lea.vmem %s40_s17, 256  ;;  %p136_p6 = scmp.lt.s32.totalorder %s40_s17, %s40_s17 }
  0x11   :  { %p132_p5 = scmp.ne.s32.totalorder %s40_s17, %s131_s18  ;;  %p137_p7 = scmp.lt.s32.totalorder %s131_s18, %s131_s18 }
  0x13   :  { %p138_p8 = por %p137_p7, %p136_p6 }
  0x15   :  { %p139_p9 = pnand %p138_p8, %p132_p5 }
  0x17   :  { %142 = shalt.err (!%p139_p9)
}
  0x18   :  { %45 = dma.hbm_to_vmem [thread:$0]  %s199_s1, 256, %s40_s17, [#allocation6], %s170_s12, %s170_s12, %s171_s13  }
  0x19   :  { %163 = dma.done.wait [#allocation3], 256  }
  0x1a   :  { %164 = vsyncadd [#allocation3], 4294967040 }
  0x1b   :  { %165 = dma.done.wait [#allocation6], 256  }
  0x1c   :  { %166 = vsyncadd [#allocation6], 4294967040  ;;  %v65_v0 = vld [vmem:[#allocation2] sm:$0xff]  ;;  %v66_v1 = vld [vmem:[#allocation2 + $0x8] sm:$0xff]  ;;  %s173_s0 = smov [#allocation7]  }
  0x1d   :  { %v67_v2 = vld [vmem:[#allocation5] sm:$0xff]  ;;  %v68_v3 = vld [vmem:[#allocation5 + $0x8] sm:$0xff]  ;;  %s83_s21 = sshll.u32 %s173_s0, 4  ;;  %s84_s21 = int_to_ptr.vmem [resolvable:$true] %s83_s21 }
  0x1e   :  { %v69_v4 = vsub.f32 %v65_v0, %v67_v2  ;;  %v70_v5 = vsub.f32 %v66_v1, %v68_v3  ;;  %s143_s22 = scalar_lea.vmem %s84_s21, 128  ;;  %p148_p11 = scmp.lt.s32.totalorder %s84_s21, %s84_s21 }
  0x1f   :  { %p144_p10 = scmp.ne.s32.totalorder %s84_s21, %s143_s22  ;;  %p149_p12 = scmp.lt.s32.totalorder %s143_s22, %s143_s22 }
  0x20   :  { %v71_v6 = vmul.f32 %v69_v4, %v69_v4  ;;  %v72_v7 = vmul.f32 %v70_v5, %v70_v5 }
  0x21   :  { %p150_p13 = por %p149_p12, %p148_p11 }
  0x22   :  { %v74_v8 = vadd.f32 %v72_v7, %v71_v6 }
  0x23   :  { %p151_p0 = pnand %p150_p13, %p144_p10 }
  0x24   :  { %76 = vst [vmem:[#allocation7] sm:$0xff] %v74_v8 }
  0x25   :  { %154 = shalt.err (!%p151_p0)
}
  0x26   :  { %86 = dma.vmem_to_hbm [thread:$0]  %s84_s21, 128, %s200_s2, [#allocation4]  }
  0x27   :  { %167 = dma.done.wait [#allocation4], 128  }
  0x28   :  { %168 = vsyncadd [#allocation4], 4294967168 }
  0x29   :  { %90 = vsyncpa [#allocation3], 1 }
  0x2a   :  { %91 = vsyncpa [#allocation6], 1 }
  0x2b   :  { %92 = vsyncpa [#allocation4], 1 }

</bundles_post_ra>
